<compile_context>
chip_gen: v5e
topology: v5e:2x2
jax: 0.10.0
libtpu: 0.0.40
codegen_flags: <defaults>
</compile_context>

<pallas_src>
import jax
import jax.numpy as jnp
from jax.experimental import pallas as pl
from jax.experimental.pallas import tpu as pltpu


_MAX_LANE_BLOCK = 8192          # lanes per tile (multiple of 128)
_MIN_LANE_BLOCK = 512           # below this an exact-divisor fold is only used
                                # when N*C is too small to fill sublanes
_MAX_ROW_BLOCK = 2048           # bounds lane-padding waste of the (rb, 2) constants
_MIN_GRID_BLOCKS = 8            # enough blocks to feed both TensorCores on v7x
_MIN_BLOCK_BYTES = 256 * 1024   # don't split blocks below this just to grow the grid


def _largest_aligned_divisor(total, align, cap):
    """Largest divisor of `total` that is a multiple of `align` and <= cap."""
    cap = min(cap, total)
    best = None
    d = align
    while d <= cap:
        if total % d == 0:
            best = d
        d += align
    return best


def _tile_budget():
    """(target_tile_bytes, vmem_limit_bytes), generation-aware.

    v5e/v6e have 128 MiB physical VMEM -> 8 MiB tiles / 64 MiB scoped limit.
    v7x has 64 MiB per TensorCore      -> 4 MiB tiles / 32 MiB scoped limit.
    """
    vmem = None
    try:
        vmem = getattr(pltpu.get_tpu_info(), "vmem_capacity_bytes", None)
    except Exception:
        vmem = None
    if vmem is not None and vmem >= 128 * 1024 * 1024:
        return 8 * 1024 * 1024, 64 * 1024 * 1024
    return 4 * 1024 * 1024, 32 * 1024 * 1024


def _plan(N, C, HW, itemsize, tile_bytes):
    """Pick the 2-D view (rows, cols), fold factor and block sizes (rb, cb)."""
    sub_align = max(8, 32 // itemsize)        # dtype-aware sublane alignment
    nc = N * C

    # ---- lane (last-dim) block -------------------------------------------
    # Prefer an exact divisor of H*W that is a multiple of 128 so the leftover
    # H*W factor can be folded into the row axis: every row then stays inside
    # one channel and every tile is a contiguous HBM slab.
    cb_div = _largest_aligned_divisor(HW, 128, _MAX_LANE_BLOCK)
    need_fold = nc < 2 * sub_align            # too few rows without folding
    if cb_div is not None and (cb_div >= _MIN_LANE_BLOCK or need_fold):
        cb = cb_div
        fold = HW // cb
    elif HW >= 128:
        # No useful exact divisor: 128-aligned lane block, ragged edge is
        # masked by the cdiv grid.
        cb = min(_MAX_LANE_BLOCK, (HW // 128) * 128)
        fold = 1
    else:
        cb = HW                               # tiny images: full-extent block
        fold = 1

    rows = nc * fold
    cols = HW // fold                         # == cb when folding

    # ---- sublane (row) block ----------------------------------------------
    row_cap = max(sub_align, tile_bytes // max(1, cb * itemsize))
    row_cap = min(row_cap, _MAX_ROW_BLOCK)
    if rows <= row_cap:
        rb = rows                             # full-extent row block (legal)
    else:
        rb = max(sub_align, (row_cap // sub_align) * sub_align)

    # ---- make sure the grid can feed both TensorCores (v7x) ----------------
    def n_blocks(rb_, cb_):
        return pl.cdiv(rows, rb_) * pl.cdiv(cols, cb_)

    while (n_blocks(rb, cb) < _MIN_GRID_BLOCKS
           and rb * cb * itemsize > _MIN_BLOCK_BYTES):
        if rb > sub_align:
            rb = max(sub_align, (rb // 2 // sub_align) * sub_align)
        elif cb > 128 and cols > 128:
            cb = max(128, (cb // 2 // 128) * 128)
        else:
            break

    return rows, cols, fold, rb, cb


def _normalize_kernel(x_ref, sb_ref, o_ref):
    # x_ref: (rb, cb) tile.  sb_ref: (rb, 2) per-row constants where
    # column 0 = 1/std and column 1 = -mean/std for that row's channel.
    # HBM-bandwidth bound: body is a single f32 multiply-add on the VPU.
    x = x_ref[...].astype(jnp.float32)
    scale = sb_ref[:, 0:1]                    # (rb, 1) -> lane broadcast
    bias = sb_ref[:, 1:2]
    o_ref[...] = (x * scale + bias).astype(o_ref.dtype)


def normalize(x, mean, std):
    """Per-channel normalization of an NCHW tensor: (x - mean[c]) / std[c]."""
    if not jnp.issubdtype(x.dtype, jnp.floating):
        raise TypeError(
            f"Normalize expects a floating-point input, got {x.dtype} "
            "(PyTorch's Normalize has the same requirement).")

    N, C, H, W = x.shape
    mean = jnp.asarray(mean, dtype=jnp.float32).reshape(C)
    std = jnp.asarray(std, dtype=jnp.float32).reshape(C)

    # Hoist the division out of the kernel (C-length work, negligible).
    scale = 1.0 / std
    bias = -mean * scale

    itemsize = jnp.dtype(x.dtype).itemsize
    tile_bytes, vmem_limit = _tile_budget()
    rows, cols, fold, rb, cb = _plan(N, C, H * W, itemsize, tile_bytes)

    # Free metadata reshape of the contiguous NCHW buffer; when fold > 1 part
    # of H*W is folded into the row axis and each row still lies within a
    # single channel.  (Non-contiguous inputs would force XLA to copy first.)
    x2 = x.reshape(rows, cols)

    # Fused (rows, 2) constants: col 0 = scale, col 1 = bias, repeated `fold`
    # times per channel and tiled over the batch.
    scale_rows = jnp.tile(jnp.repeat(scale, fold), N)
    bias_rows = jnp.tile(jnp.repeat(bias, fold), N)
    sb = jnp.stack([scale_rows, bias_rows], axis=1)          # (rows, 2) f32

    grid = (pl.cdiv(rows, rb), pl.cdiv(cols, cb))            # rows outer, cols inner

    out2 = pl.pallas_call(
        _normalize_kernel,
        out_shape=jax.ShapeDtypeStruct((rows, cols), x.dtype),
        grid=grid,
        in_specs=[
            pl.BlockSpec((rb, cb), lambda i, j: (i, j)),     # x tile
            # Intentionally constant along the inner (cols) axis so the
            # per-row constants are not re-DMA'd during the inner sweep.
            pl.BlockSpec((rb, 2), lambda i, j: (i, 0)),      # fused scale/bias
        ],
        out_specs=pl.BlockSpec((rb, cb), lambda i, j: (i, j)),
        compiler_params=pltpu.CompilerParams(
            dimension_semantics=("parallel", "parallel"),
            vmem_limit_bytes=vmem_limit,
        ),
        cost_estimate=pl.CostEstimate(
            flops=2 * rows * cols,
            transcendentals=0,
            bytes_accessed=2 * rows * cols * itemsize + rows * 2 * 4,
        ),
    )(x2, sb)

    return out2.reshape(N, C, H, W)


if __name__ == "__main__":
    key = jax.random.PRNGKey(0)
    N, C, H, W = 2, 4, 16, 16

    x = jax.random.normal(key, (N, C, H, W), dtype=jnp.float32)

    # Deterministic per-channel normalization constants (module __init__ args).
    mean = jnp.array([0.10, 0.20, 0.30, 0.40], dtype=jnp.float32)
    std = jnp.array([0.50, 0.60, 0.70, 0.80], dtype=jnp.float32)

    out = normalize(x, mean, std)
    jax.block_until_ready(out)

    # Reference check (plain JAX broadcast, same semantics as the PyTorch loop).
    # Kernel uses x * (1/std) + (-mean/std), ~1 ulp from true division.
    ref = (x - mean[None, :, None, None]) / std[None, :, None, None]
    assert out.shape == x.shape and out.dtype == x.dtype
    assert jnp.allclose(out, ref, atol=1e-5, rtol=1e-5)

    print("KERNEL_OK")
</pallas_src>

<mosaic_0001>
module attributes {stable_mosaic.version = 11 : i64} {
  func.func @_normalize_kernel(%arg0: i32, %arg1: i32, %arg2: memref<8x256xf32, #tpu.memory_space<vmem>>, %arg3: memref<8x2xf32, #tpu.memory_space<vmem>>, %arg4: memref<8x256xf32, #tpu.memory_space<vmem>>) attributes {dimension_semantics = [#tpu.dimension_semantics<parallel>, #tpu.dimension_semantics<parallel>], iteration_bounds = array<i64: 1, 1>, scalar_prefetch = 0 : i64, scratch_operands = 0 : i64, tpu.core_type = #tpu.core_type<tc>, window_params = [{transform_indices = @transform_0, window_bounds = array<i64: 8, 256>}, {transform_indices = @transform_1, window_bounds = array<i64: 8, 2>}, {transform_indices = @transform_2, window_bounds = array<i64: 8, 256>}]} {
    %c0 = arith.constant 0 : index
    %c0_0 = arith.constant 0 : index
    %0 = vector.load %arg2[%c0, %c0_0] : memref<8x256xf32, #tpu.memory_space<vmem>>, vector<8x256xf32>
    %c0_1 = arith.constant 0 : index
    %c0_2 = arith.constant 0 : index
    %1 = vector.load %arg3[%c0_1, %c0_2] : memref<8x2xf32, #tpu.memory_space<vmem>>, vector<8x1xf32>
    %c0_3 = arith.constant 0 : index
    %c1 = arith.constant 1 : index
    %2 = vector.load %arg3[%c0_3, %c1] : memref<8x2xf32, #tpu.memory_space<vmem>>, vector<8x1xf32>
    %3 = vector.broadcast %1 : vector<8x1xf32> to vector<8x256xf32>
    %4 = arith.mulf %0, %3 : vector<8x256xf32>
    %5 = vector.broadcast %2 : vector<8x1xf32> to vector<8x256xf32>
    %6 = arith.addf %4, %5 : vector<8x256xf32>
    %c0_4 = arith.constant 0 : index
    %c0_5 = arith.constant 0 : index
    %7 = vector.load %arg4[%c0_4, %c0_5] : memref<8x256xf32, #tpu.memory_space<vmem>>, vector<8x256xf32>
    tpu.vector_store %arg4[%c0_4, %c0_5], %6 {strides = array<i32>} : memref<8x256xf32, #tpu.memory_space<vmem>>, vector<8x256xf32>,
    return
  }
  func.func @transform_0(%arg0: i32, %arg1: i32) -> (i32, i32) {
    %c0_i32 = arith.constant 0 : i32
    return %arg0, %arg1 : i32, i32
  }
  func.func @transform_1(%arg0: i32, %arg1: i32) -> (i32, i32) {
    %c0_i32 = arith.constant 0 : i32
    %c0_i32_0 = arith.constant 0 : i32
    return %arg0, %c0_i32 : i32, i32
  }
  func.func @transform_2(%arg0: i32, %arg1: i32) -> (i32, i32) {
    %c0_i32 = arith.constant 0 : i32
    return %arg0, %arg1 : i32, i32
  }
}

</mosaic_0001>

<bundles_post_ra>
// kernel: tpu_custom_call.1
= control target key start
LH: loop header
LB: loop body
LE: loop exit
PB: predicated region body
PF: predicated region fallthrough
CT: control target
= control target key end

     0   :  { %7 = vsyncpa [#allocation3], 0  ;;  %s147_s0 = inlined_call_operand.hbm [shape: f32[8,256], index: 0, kind: input, shape index: {}]   ;;  %s148_s1 = inlined_call_operand.vmem [shape: f32[8,2], index: 1, kind: input, shape index: {}]   ;;  %s149_s2 = inlined_call_operand.hbm [shape: f32[8,256], index: 2, kind: output, shape index: {}]  }
   0x1   :  { %8 = vsyncpa [#allocation4], 0  ;;  %s14_s11 = sshll.u32 %s147_s0, 4  ;;  %s119_s12 = smov [#allocation2]   ;;  %s15_s11 = int_to_ptr.hbm [resolvable:$true] %s14_s11 }
   0x2   :  { %s16_s13 = sshll.u32 %s119_s12, 4  ;;  %s17_s13 = int_to_ptr.vmem [resolvable:$true] %s16_s13 }
   0x3   :  { %19 = dma.hbm_to_vmem [thread:$0]  %s15_s11, 256, %s17_s13, [#allocation3]  }
   0x4   :  { %115 = dma.done.wait [#allocation3], 256  }
   0x5   :  { %116 = vsyncadd [#allocation3], 4294967040  ;;  %v120_v0 = vmov 0   ;;  %v28_v1 = vld [vmem:[%s148_s1] sm:$0xff]  ;;  %v121_v2 = vmov 1   ;;  %v27_v5 = vld [vmem:[#allocation2 + $0x8] sm:$0xff] }
   0x6   :  { %65 = vset.pattern.permute.xlu0 %v120_v0  ;;  %v26_v4 = vld [vmem:[#allocation2] sm:$0xff]  ;;  %s122_s0 = smov [#allocation5]   ;;  %s51_s19 = sshll.u32 %s149_s2, 4  ;;  %s52_s19 = int_to_ptr.hbm [resolvable:$true] %s51_s19 }
   0x7   :  { %31 = vperm.xlu0 %65, %v28_v1   ;;  %s49_s16 = sshll.u32 %s122_s0, 4  ;;  %s50_s16 = int_to_ptr.vmem [resolvable:$true] %s49_s16 }
   0xf   :  { %66 = vset.pattern.permute.xlu0 %v121_v2 }
  0x10   :  { %37 = vperm.xlu0 %66, %v28_v1  }
  0x79   :  { %v32_v3 = vpop.permute.xlu0 %31 }
  0x7a   :  { %v34_v6 = vmul.f32 %v32_v3, %v26_v4  ;;  %v35_v7 = vmul.f32 %v32_v3, %v27_v5 }
  0x82   :  { %v38_v8 = vpop.permute.xlu0 %37 }
  0x83   :  { %v40_v9 = vadd.f32 %v38_v8, %v34_v6  ;;  %v41_v10 = vadd.f32 %v38_v8, %v35_v7 }
  0x85   :  { %42 = vst [vmem:[#allocation5] sm:$0xff] %v40_v9 }
  0x86   :  { %43 = vst [vmem:[#allocation5 + $0x8] sm:$0xff] %v41_v10 }
  0x87   :  { %54 = dma.vmem_to_hbm [thread:$0]  %s50_s16, 256, %s52_s19, [#allocation4]  }
  0x88   :  { %117 = dma.done.wait [#allocation4], 256  }
  0x89   :  { %118 = vsyncadd [#allocation4], 4294967040 }
  0x8a   :  { %59 = vsyncpa [#allocation3], 1 }
  0x8b   :  { %60 = vsyncpa [#allocation4], 1 }

</bundles_post_ra>
